<compile_context>
chip_gen: v7x
topology: tpu7x:2x2x1
jax: 0.10.0
libtpu: 0.0.40
codegen_flags: <defaults>
</compile_context>

<pallas_src>
import functools

import jax
import jax.numpy as jnp
from jax import lax
from jax.experimental import pallas as pl
from jax.experimental.pallas import tpu as pltpu

EPS = 1e-7            # f32-appropriate guard (1e-15 risks overflow through 1/eps chains)
EPS_SQ = EPS * EPS
ATANH_CLIP = 1.0 - 1e-7
_N_CONSTS = 9


# ----------------------------------------------------------------------------
# Pure-jnp Poincare-ball helpers (reference + tiny wrapper-side finalize math).
# ----------------------------------------------------------------------------
def _sqnorm(v):
    return jnp.sum(v * v, axis=-1, keepdims=True)


def _safe_norm(v):
    return jnp.maximum(jnp.sqrt(jnp.maximum(_sqnorm(v), 0.0)), EPS)


def _artanh(z):
    z = jnp.clip(z, -ATANH_CLIP, ATANH_CLIP)
    return 0.5 * jnp.log((1.0 + z) / (1.0 - z))


def _lambda_x(x, c):
    return 2.0 / jnp.maximum(1.0 - c * _sqnorm(x), EPS)


def _mobius_add(x, y, c):
    x2 = _sqnorm(x)
    y2 = _sqnorm(y)
    xy = jnp.sum(x * y, axis=-1, keepdims=True)
    num = (1.0 + 2.0 * c * xy + c * y2) * x + (1.0 - c * x2) * y
    den = 1.0 + 2.0 * c * xy + (c * c) * x2 * y2
    return num / jnp.maximum(den, EPS)


def _gyration(u, v, w, c):
    u2 = _sqnorm(u)
    v2 = _sqnorm(v)
    uv = jnp.sum(u * v, axis=-1, keepdims=True)
    uw = jnp.sum(u * w, axis=-1, keepdims=True)
    vw = jnp.sum(v * w, axis=-1, keepdims=True)
    c2 = c * c
    a = -c2 * uw * v2 + c * vw + 2.0 * c2 * uv * vw
    b = -c2 * vw * u2 - c * uw
    d = 1.0 + 2.0 * c * uv + c2 * u2 * v2
    return w + 2.0 * (a * u + b * v) / jnp.maximum(d, EPS)


# Kernel-side artanh: approximate EUP reciprocal for the (1+z)/(1-z) divide.
def _artanh_fast(z):
    z = jnp.clip(z, -ATANH_CLIP, ATANH_CLIP)
    return 0.5 * jnp.log((1.0 + z) * pl.reciprocal(1.0 - z, approx=True))


# ----------------------------------------------------------------------------
# In-kernel lane-group fold: sum a (R, T) block into (R, width) using a
# balanced add tree of static, lane-aligned slices.  No XLU work; the final
# 'width'-lane collapse happens once per (batch, split) on the last grid step.
# ----------------------------------------------------------------------------
def _lane_fold(v, width):
    t = v.shape[-1]
    if t == width:
        return v
    chunks = [v[:, g * width:(g + 1) * width] for g in range(t // width)]
    while len(chunks) > 1:
        nxt = [chunks[i] + chunks[i + 1] for i in range(0, len(chunks) - 1, 2)]
        if len(chunks) % 2:
            nxt.append(chunks[-1])
        chunks = nxt
    return chunks[0]


def _fold_width(tile_m, max_chunks=64):
    """Accumulator lane width: keep the static unroll (#chunks) bounded."""
    w = 128
    while tile_m // w > max_chunks and tile_m % (w * 2) == 0:
        w *= 2
    return w


# ----------------------------------------------------------------------------
# Kernel 1: per-(batch, spatial-split) partial sums for the gyro-midpoint.
#   num = sum_spatial lam * x     (C, 1)
#   den = sum_spatial (lam - 1)   (1, 1)
# ----------------------------------------------------------------------------
def _midpoint_kernel(x_ref, num_ref, den_ref, num_acc, den_acc, *,
                     c, fold_w, tile_m, n_m_inner, hw_valid, masked):
    m = pl.program_id(2)

    @pl.when(m == 0)
    def _():
        num_acc[...] = jnp.zeros_like(num_acc)
        den_acc[...] = jnp.zeros_like(den_acc)

    x = x_ref[0].astype(jnp.float32)                       # (C, T)
    x2 = jnp.sum(x * x, axis=0, keepdims=True)             # (1, T)
    lam = 2.0 * pl.reciprocal(jnp.maximum(1.0 - c * x2, EPS), approx=True)
    den_c = lam - 1.0
    if masked:
        start = (pl.program_id(1) * n_m_inner + m) * tile_m
        pos = start + lax.broadcasted_iota(jnp.int32, x2.shape, 1)
        den_c = jnp.where(pos < hw_valid, den_c, 0.0)
        # padded x is exactly zero, so lam * x needs no mask.
    num_acc[...] += _lane_fold(lam * x, fold_w)            # (C, fold_w), pure VPU
    den_acc[...] += _lane_fold(den_c, fold_w)              # (1, fold_w)

    @pl.when(m == pl.num_programs(2) - 1)
    def _():
        num_ref[0, 0] = jnp.sum(num_acc[...], axis=-1, keepdims=True)   # (C, 1)
        den_ref[0, 0] = jnp.sum(den_acc[...], axis=-1, keepdims=True)   # (1, 1)


# ----------------------------------------------------------------------------
# Kernel 2: per-(batch, spatial-split) partial sum of squared Poincare
# distances to the midpoint (Frechet variance numerator).
# ----------------------------------------------------------------------------
def _variance_kernel(x_ref, mid_ref, var_ref, acc, *,
                     c, fold_w, tile_m, n_m_inner, hw_valid, masked):
    m = pl.program_id(2)
    sqrt_c = c ** 0.5
    c2 = c * c

    @pl.when(m == 0)
    def _():
        acc[...] = jnp.zeros_like(acc)

    x = x_ref[0].astype(jnp.float32)                       # (C, T)
    mu = mid_ref[...]                                      # (C, 1)
    mu2 = jnp.sum(mu * mu, axis=0, keepdims=True)          # (1, 1)

    # diff = mobius_add(-mu, x)
    xy = -jnp.sum(mu * x, axis=0, keepdims=True)           # (1, T)
    y2 = jnp.sum(x * x, axis=0, keepdims=True)             # (1, T)
    num = (1.0 + 2.0 * c * xy + c * y2) * (-mu) + (1.0 - c * mu2) * x
    den = jnp.maximum(1.0 + 2.0 * c * xy + c2 * (mu2 * y2), EPS)
    diff = num * pl.reciprocal(den, approx=True)           # (C, T)

    dsq = jnp.sum(diff * diff, axis=0, keepdims=True)      # (1, T)
    dn = jnp.sqrt(jnp.maximum(dsq, 0.0))
    # exact artanh here: the variance squares these distances and the approx
    # reciprocal error blows up near the ball boundary.
    dist = (2.0 / sqrt_c) * _artanh(sqrt_c * dn)
    contrib = dist * dist
    if masked:
        start = (pl.program_id(1) * n_m_inner + m) * tile_m
        pos = start + lax.broadcasted_iota(jnp.int32, dsq.shape, 1)
        contrib = jnp.where(pos < hw_valid, contrib, 0.0)
    acc[...] += _lane_fold(contrib, fold_w)                # (1, fold_w)

    @pl.when(m == pl.num_programs(2) - 1)
    def _():
        var_ref[0, 0] = jnp.sum(acc[...], axis=-1, keepdims=True)       # (1, 1)


# ----------------------------------------------------------------------------
# Kernel 3: elementwise transform  logmap_mu -> ptransp(mu -> t) -> rescale
#           -> expmap_t, on (C, TILE_M) lane-dense blocks.
# All block-invariant scalars arrive precomputed in SMEM `consts` (shape (9,)):
#   0: 2 / (sqrt_c * lam_mu)
#   1: (lam_mu / lam_t) * sqrt(gamma / (frechet_var + 1e-6))
#   2: 0.5 * sqrt_c * lam_t
#   3: ||mu||^2        4: ||t||^2       5: <t, -mu>
#   6: 2 / gyration denominator         7: 1 - c*||mu||^2   8: 1 - c*||t||^2
# ----------------------------------------------------------------------------
def _transform_kernel(consts_ref, x_ref, mid_ref, t_ref, o_ref, *, c):
    sqrt_c = c ** 0.5
    c2 = c * c

    u_coeff = consts_ref[0]
    vscale = consts_ref[1]
    exp_coeff = consts_ref[2]
    mu2 = consts_ref[3]
    t2 = consts_ref[4]
    uv = consts_ref[5]
    two_over_d = consts_ref[6]
    coef_y1 = consts_ref[7]
    coef_y2 = consts_ref[8]

    x = x_ref[0].astype(jnp.float32)                       # (C, T)
    mu = mid_ref[...]                                      # (C, 1)
    t = t_ref[...]                                         # (C, 1)

    # sub = mobius_add(-mu, x)
    xy = -jnp.sum(mu * x, axis=0, keepdims=True)           # (1, T)
    y2 = jnp.sum(x * x, axis=0, keepdims=True)             # (1, T)
    coef_x = 1.0 + 2.0 * c * xy + c * y2
    den1 = jnp.maximum(1.0 + 2.0 * c * xy + c2 * (mu2 * y2), EPS)
    sub = (coef_x * (-mu) + coef_y1 * x) * pl.reciprocal(den1, approx=True)

    # u = logmap_mu(x)
    sub_sq = jnp.sum(sub * sub, axis=0, keepdims=True)
    inv_sub_norm = lax.rsqrt(jnp.maximum(sub_sq, EPS_SQ))
    sub_norm = sub_sq * inv_sub_norm
    u = (u_coeff * _artanh_fast(sqrt_c * sub_norm) * inv_sub_norm) * sub

    # gyr[t, -mu] u   (block-invariant pieces precomputed)
    uw = jnp.sum(t * u, axis=0, keepdims=True)
    vw = -jnp.sum(mu * u, axis=0, keepdims=True)
    a_co = c * vw + (2.0 * c2) * (uv * vw) - c2 * (mu2 * uw)
    b_co = -c2 * (t2 * vw) - c * uw
    gyr = u + two_over_d * (a_co * t - b_co * mu)

    # parallel-transport factor * batch-norm rescale
    v = vscale * gyr

    # expmap at t
    v_sq = jnp.sum(v * v, axis=0, keepdims=True)
    inv_v_norm = lax.rsqrt(jnp.maximum(v_sq, EPS_SQ))
    v_norm = v_sq * inv_v_norm
    second = (jnp.tanh(exp_coeff * v_norm) * inv_v_norm * (1.0 / sqrt_c)) * v

    # out = mobius_add(t, second)
    s2 = jnp.sum(second * second, axis=0, keepdims=True)
    ts = jnp.sum(t * second, axis=0, keepdims=True)
    numo = (1.0 + 2.0 * c * ts + c * s2) * t + coef_y2 * second
    deno = jnp.maximum(1.0 + 2.0 * c * ts + c2 * (t2 * s2), EPS)
    o_ref[0] = (numo * pl.reciprocal(deno, approx=True)).astype(o_ref.dtype)


# ----------------------------------------------------------------------------
# Generation-aware tiling / VMEM budgeting.
# ----------------------------------------------------------------------------
def _vmem_budget_bytes():
    try:
        cap = int(pltpu.get_tpu_info().vmem_capacity_bytes)
    except Exception:
        cap = 64 * 1024 * 1024          # conservative fallback (v7x physical)
    # 96 MiB on 128-MiB chips (v5e/v6e), 48 MiB on v7x (64 MiB physical).
    return max(32 * 1024 * 1024, min((cap * 3) // 4, 96 * 1024 * 1024))


def _pick_tile(hw_pad, channels, block_byte_cap, lane_cap=131072):
    # Largest multiple of 128 dividing hw_pad, under both the per-block byte
    # cap (stage-3 footprint = ~4x block) and an absolute lane cap.
    byte_lanes = (block_byte_cap // (4 * max(channels, 1))) // 128 * 128
    t = min(hw_pad, lane_cap, max(128, byte_lanes))
    t = max(128, (t // 128) * 128)
    while hw_pad % t != 0:
        t -= 128
    # Ensure at least 2 spatial tiles when possible: lets both v7x TensorCores
    # work on the reduction passes even for B == 1; negligible cost elsewhere.
    if hw_pad // t < 2 and hw_pad >= 256:
        t = (hw_pad // 2 // 128) * 128
        while hw_pad % t != 0:
            t -= 128
    return t


# ----------------------------------------------------------------------------
# Wrapper: PoincareBatchNorm2d.forward
# ----------------------------------------------------------------------------
def poincare_batch_norm_2d(x_nchw, mean_param, var_param, *, c=1.0, tile_m=None):
    B, C, H, W = x_nchw.shape
    HW = H * W
    N = B * HW
    sqrt_c = c ** 0.5

    # Spatial axis padded to a multiple of 128; reductions mask padded lanes.
    hw_pad = ((HW + 127) // 128) * 128
    masked = hw_pad != HW

    vmem_limit = _vmem_budget_bytes()
    block_byte_cap = vmem_limit // 12
    if tile_m is None:
        tile_m = _pick_tile(hw_pad, C, block_byte_cap)
    assert tile_m % 128 == 0 and hw_pad % tile_m == 0
    fold_w = _fold_width(tile_m)

    n_m = hw_pad // tile_m
    n_split = 2 if (n_m % 2 == 0 and n_m >= 2) else 1
    n_m_inner = n_m // n_split

    # NCHW viewed as (B, C, H*W) -- metadata-only reshape, no HBM transpose.
    x3 = x_nchw.reshape(B, C, HW)
    if masked:
        # TODO(synk): a fused masked-load path could avoid this one extra HBM copy.
        x3 = jnp.pad(x3, ((0, 0), (0, 0), (0, hw_pad - HW)))

    cparams_red = pltpu.CompilerParams(
        dimension_semantics=("parallel", "parallel", "arbitrary"),
        vmem_limit_bytes=vmem_limit)
    cparams_map = pltpu.CompilerParams(
        dimension_semantics=("parallel", "parallel"),
        vmem_limit_bytes=vmem_limit)

    red_grid = (B, n_split, n_m_inner)
    x_spec_red = pl.BlockSpec((1, C, tile_m),
                              lambda b, s, m: (b, 0, s * n_m_inner + m))
    mid_spec_red = pl.BlockSpec((C, 1), lambda b, s, m: (0, 0))

    red_kwargs = dict(c=c, fold_w=fold_w, tile_m=tile_m, n_m_inner=n_m_inner,
                      hw_valid=HW, masked=masked)

    # --- stage 1: per-(batch, split) midpoint partial sums ----------------------
    num_part, den_part = pl.pallas_call(
        functools.partial(_midpoint_kernel, **red_kwargs),
        out_shape=(jax.ShapeDtypeStruct((B, n_split, C, 1), jnp.float32),
                   jax.ShapeDtypeStruct((B, n_split, 1, 1), jnp.float32)),
        grid_spec=pltpu.PrefetchScalarGridSpec(
            num_scalar_prefetch=0,
            grid=red_grid,
            in_specs=[x_spec_red],
            out_specs=[pl.BlockSpec((1, 1, C, 1), lambda b, s, m: (b, s, 0, 0)),
                       pl.BlockSpec((1, 1, 1, 1), lambda b, s, m: (b, s, 0, 0))],
            scratch_shapes=[pltpu.VMEM((C, fold_w), jnp.float32),
                            pltpu.VMEM((1, fold_w), jnp.float32)],
        ),
        compiler_params=cparams_red,
    )(x3)

    # finalize midpoint with tiny jnp ops
    num = jnp.sum(num_part, axis=(0, 1))                   # (C, 1)
    den = jnp.sum(den_part)                                # scalar
    den = jnp.where(jnp.abs(den) < EPS, EPS, den)          # guard (no-op normally)
    m_vec = num / den
    m_norm = jnp.maximum(jnp.sqrt(jnp.sum(m_vec * m_vec)), EPS)
    mid = jnp.tanh(0.5 * _artanh(sqrt_c * m_norm)) * m_vec / (sqrt_c * m_norm)  # (C, 1)

    # --- stage 2: Frechet variance ----------------------------------------------
    var_part = pl.pallas_call(
        functools.partial(_variance_kernel, **red_kwargs),
        out_shape=jax.ShapeDtypeStruct((B, n_split, 1, 1), jnp.float32),
        grid_spec=pltpu.PrefetchScalarGridSpec(
            num_scalar_prefetch=0,
            grid=red_grid,
            in_specs=[x_spec_red, mid_spec_red],
            out_specs=pl.BlockSpec((1, 1, 1, 1), lambda b, s, m: (b, s, 0, 0)),
            scratch_shapes=[pltpu.VMEM((1, fold_w), jnp.float32)],
        ),
        compiler_params=cparams_red,
    )(x3, mid)
    fvar = jnp.sum(var_part) / float(N)

    # --- hoisted loop-invariant constants (tiny jnp ops) ------------------------
    gamma = jnp.asarray(var_param, jnp.float32).reshape(())
    w = jnp.asarray(mean_param, jnp.float32).reshape(C, 1)
    w_norm = jnp.maximum(jnp.sqrt(jnp.sum(w * w)), EPS)
    t_ball = jnp.tanh(sqrt_c * w_norm) * w / (sqrt_c * w_norm)   # expmap0(mean), (C, 1)

    mu2 = jnp.sum(mid * mid)
    t2 = jnp.sum(t_ball * t_ball)
    lam_mu = 2.0 / jnp.maximum(1.0 - c * mu2, EPS)
    lam_t = 2.0 / jnp.maximum(1.0 - c * t2, EPS)
    scale = jnp.sqrt(gamma / (fvar + 1e-6))
    uv = -jnp.sum(t_ball * mid)
    d_gyr = 1.0 + 2.0 * c * uv + c * c * t2 * mu2
    consts = jnp.stack([
        2.0 / (sqrt_c * lam_mu),
        (lam_mu / lam_t) * scale,
        0.5 * sqrt_c * lam_t,
        mu2, t2, uv,
        2.0 / jnp.maximum(d_gyr, EPS),
        1.0 - c * mu2,
        1.0 - c * t2,
    ]).astype(jnp.float32)                                 # (9,), delivered via SMEM

    # --- stage 3: elementwise transform ------------------------------------------
    y3 = pl.pallas_call(
        functools.partial(_transform_kernel, c=c),
        out_shape=jax.ShapeDtypeStruct((B, C, hw_pad), x_nchw.dtype),
        grid_spec=pltpu.PrefetchScalarGridSpec(
            num_scalar_prefetch=0,
            grid=(B, n_m),
            in_specs=[pl.BlockSpec(memory_space=pltpu.SMEM),
                      pl.BlockSpec((1, C, tile_m), lambda b, m: (b, 0, m)),
                      pl.BlockSpec((C, 1), lambda b, m: (0, 0)),
                      pl.BlockSpec((C, 1), lambda b, m: (0, 0))],
            out_specs=pl.BlockSpec((1, C, tile_m), lambda b, m: (b, 0, m)),
        ),
        compiler_params=cparams_map,
    )(consts, x3, mid, t_ball)

    if masked:
        y3 = y3[:, :, :HW]
    return y3.reshape(B, C, H, W)


# ----------------------------------------------------------------------------
# Pure-JAX reference (PyTorch-faithful math on the (N, C) view).
# ----------------------------------------------------------------------------
def _reference(x_nchw, mean_param, var_param, c=1.0):
    B, C, H, W = x_nchw.shape
    x = jnp.transpose(x_nchw, (0, 2, 3, 1)).reshape(-1, C).astype(jnp.float32)
    sqrt_c = c ** 0.5

    lam = _lambda_x(x, c)
    m = jnp.sum(lam * x, axis=0, keepdims=True) / jnp.sum(lam - 1.0)
    m_norm = _safe_norm(m)
    mu = jnp.tanh(0.5 * _artanh(sqrt_c * m_norm)) * m / (sqrt_c * m_norm)

    diff = _mobius_add(-mu, x, c)
    d = (2.0 / sqrt_c) * _artanh(sqrt_c * jnp.sqrt(jnp.maximum(_sqnorm(diff), 0.0)))
    fvar = jnp.mean(d * d)

    w = jnp.asarray(mean_param, jnp.float32).reshape(1, C)
    w_norm = _safe_norm(w)
    t = jnp.tanh(sqrt_c * w_norm) * w / (sqrt_c * w_norm)

    sub = _mobius_add(-mu, x, c)
    sub_norm = _safe_norm(sub)
    lam_mu = _lambda_x(mu, c)
    u = (2.0 / (sqrt_c * lam_mu)) * _artanh(sqrt_c * sub_norm) * sub / sub_norm
    lam_t = _lambda_x(t, c)
    v = _gyration(t, -mu, u, c) * (lam_mu / lam_t)
    v = jnp.sqrt(jnp.asarray(var_param, jnp.float32) / (fvar + 1e-6)) * v
    v_norm = _safe_norm(v)
    second = jnp.tanh(sqrt_c * lam_t * v_norm * 0.5) * v / (sqrt_c * v_norm)
    y = _mobius_add(t, second, c)
    return jnp.transpose(y.reshape(B, H, W, C), (0, 3, 1, 2))


def _make_input(key, B, C, H, W):
    v = jax.random.normal(key, (B, C, H, W), jnp.float32)
    # project channel vectors strictly inside the Poincare ball (||x||_channel < 0.5)
    vnorm = jnp.sqrt(jnp.sum(v * v, axis=1, keepdims=True))
    return 0.5 * v / (1.0 + vnorm)


if __name__ == "__main__":
    curvature = 1.0
    key = jax.random.PRNGKey(0)
    k1, k2 = jax.random.split(key)

    # parameters exactly as PoincareBatchNorm.__init__: mean = zeros(features), var = 1.0
    # TODO(synk): running_mean / running_var buffers and the `updates` counter are
    # training-state bookkeeping never used in forward(); not modelled here.

    # Case 1: H*W divisible by 128 (lane-dense fast path, spatial-split grid).
    B, C, H, W = 2, 4, 16, 16
    mean_param = jnp.zeros((C,), jnp.float32)
    var_param = jnp.float32(1.0)
    x1 = _make_input(k1, B, C, H, W)
    y1 = jax.block_until_ready(poincare_batch_norm_2d(x1, mean_param, var_param, c=curvature))
    y1_ref = _reference(x1, mean_param, var_param, c=curvature)
    assert y1.shape == (B, C, H, W)
    assert bool(jnp.all(jnp.isfinite(y1)))
    err1 = float(jnp.max(jnp.abs(y1 - y1_ref)))
    assert bool(jnp.allclose(y1, y1_ref, rtol=1e-2, atol=5e-4)), err1

    # Case 2: H*W NOT divisible by 128 (7x7 -> padded + masked reductions).
    B2, C2, H2, W2 = 2, 4, 7, 7
    mean_param2 = jnp.zeros((C2,), jnp.float32)
    var_param2 = jnp.float32(1.0)
    x2 = _make_input(k2, B2, C2, H2, W2)
    y2 = jax.block_until_ready(poincare_batch_norm_2d(x2, mean_param2, var_param2, c=curvature))
    y2_ref = _reference(x2, mean_param2, var_param2, c=curvature)
    assert y2.shape == (B2, C2, H2, W2)
    assert bool(jnp.all(jnp.isfinite(y2)))
    err2 = float(jnp.max(jnp.abs(y2 - y2_ref)))
    assert bool(jnp.allclose(y2, y2_ref, rtol=1e-2, atol=5e-4)), err2

    print("KERNEL_OK")
</pallas_src>

<mosaic_0001>
module attributes {stable_mosaic.version = 11 : i64} {
  func.func @_midpoint_kernel(%arg0: i32, %arg1: i32, %arg2: i32, %arg3: memref<1x4x128xf32, #tpu.memory_space<vmem>>, %arg4: memref<1x1x4x1xf32, #tpu.memory_space<vmem>>, %arg5: memref<1x1x1x1xf32, #tpu.memory_space<vmem>>, %arg6: memref<4x128xf32, #tpu.memory_space<vmem>>, %arg7: memref<1x128xf32, #tpu.memory_space<vmem>>) attributes {dimension_semantics = [#tpu.dimension_semantics<parallel>, #tpu.dimension_semantics<parallel>, #tpu.dimension_semantics<arbitrary>], iteration_bounds = array<i64: 2, 2, 1>, scalar_prefetch = 0 : i64, scratch_operands = 2 : i64, tpu.core_type = #tpu.core_type<tc>, window_params = [{transform_indices = @transform_0, window_bounds = array<i64: 1, 4, 128>}, {transform_indices = @transform_1, window_bounds = array<i64: 1, 1, 4, 1>}, {transform_indices = @transform_2, window_bounds = array<i64: 1, 1, 1, 1>}]} {
    %c0_i32 = arith.constant 0 : i32
    %0 = arith.cmpi eq, %arg2, %c0_i32 : i32
    %1 = arith.extui %0 : i1 to i32
    %c0_i32_0 = arith.constant 0 : i32
    %2 = arith.cmpi ne, %1, %c0_i32_0 : i32
    scf.if %2 {
      %cst_18 = arith.constant 0.000000e+00 : f32
      %30 = vector.broadcast %cst_18 : f32 to vector<4x128xf32>
      %c0_19 = arith.constant 0 : index
      %c0_20 = arith.constant 0 : index
      %31 = vector.load %arg6[%c0_19, %c0_20] : memref<4x128xf32, #tpu.memory_space<vmem>>, vector<4x128xf32>
      tpu.vector_store %arg6[%c0_19, %c0_20], %30 {strides = array<i32>} : memref<4x128xf32, #tpu.memory_space<vmem>>, vector<4x128xf32>,
      %cst_21 = arith.constant 0.000000e+00 : f32
      %32 = vector.broadcast %cst_21 : f32 to vector<1x128xf32>
      %c0_22 = arith.constant 0 : index
      %c0_23 = arith.constant 0 : index
      %33 = vector.load %arg7[%c0_22, %c0_23] : memref<1x128xf32, #tpu.memory_space<vmem>>, vector<1x128xf32>
      tpu.vector_store %arg7[%c0_22, %c0_23], %32 {strides = array<i32>} : memref<1x128xf32, #tpu.memory_space<vmem>>, vector<1x128xf32>,
    } else {
    }
    %c0 = arith.constant 0 : index
    %c0_1 = arith.constant 0 : index
    %c0_2 = arith.constant 0 : index
    %3 = vector.load %arg3[%c0, %c0_1, %c0_2] : memref<1x4x128xf32, #tpu.memory_space<vmem>>, vector<1x4x128xf32>
    %4 = vector.shape_cast %3 : vector<1x4x128xf32> to vector<4x128xf32>
    %5 = arith.mulf %4, %4 : vector<4x128xf32>
    %cst = arith.constant dense<0.000000e+00> : vector<128xf32>
    %6 = vector.multi_reduction <add>, %5, %cst [0] : vector<4x128xf32> to vector<128xf32>
    %7 = vector.shape_cast %6 : vector<128xf32> to vector<1x128xf32>
    %cst_3 = arith.constant 1.000000e+00 : f32
    %8 = vector.broadcast %cst_3 : f32 to vector<1x128xf32>
    %9 = arith.mulf %8, %7 : vector<1x128xf32>
    %cst_4 = arith.constant 1.000000e+00 : f32
    %10 = vector.broadcast %cst_4 : f32 to vector<1x128xf32>
    %11 = arith.subf %10, %9 : vector<1x128xf32>
    %cst_5 = arith.constant 1.000000e-07 : f32
    %12 = vector.broadcast %cst_5 : f32 to vector<1x128xf32>
    %13 = arith.maximumf %11, %12 : vector<1x128xf32>
    %14 = tpu.reciprocal %13 {approx = true} : vector<1x128xf32> -> vector<1x128xf32>
    %cst_6 = arith.constant 2.000000e+00 : f32
    %15 = vector.broadcast %cst_6 : f32 to vector<1x128xf32>
    %16 = arith.mulf %15, %14 : vector<1x128xf32>
    %cst_7 = arith.constant 1.000000e+00 : f32
    %17 = vector.broadcast %cst_7 : f32 to vector<1x128xf32>
    %18 = arith.subf %16, %17 : vector<1x128xf32>
    %c0_8 = arith.constant 0 : index
    %c0_9 = arith.constant 0 : index
    %19 = vector.load %arg6[%c0_8, %c0_9] : memref<4x128xf32, #tpu.memory_space<vmem>>, vector<4x128xf32>
    %20 = vector.broadcast %16 : vector<1x128xf32> to vector<4x128xf32>
    %21 = arith.mulf %20, %4 : vector<4x128xf32>
    %22 = arith.addf %19, %21 : vector<4x128xf32>
    %c0_10 = arith.constant 0 : index
    %c0_11 = arith.constant 0 : index
    %23 = vector.load %arg6[%c0_10, %c0_11] : memref<4x128xf32, #tpu.memory_space<vmem>>, vector<4x128xf32>
    tpu.vector_store %arg6[%c0_10, %c0_11], %22 {strides = array<i32>} : memref<4x128xf32, #tpu.memory_space<vmem>>, vector<4x128xf32>,
    %c0_12 = arith.constant 0 : index
    %c0_13 = arith.constant 0 : index
    %24 = vector.load %arg7[%c0_12, %c0_13] : memref<1x128xf32, #tpu.memory_space<vmem>>, vector<1x128xf32>
    %25 = arith.addf %24, %18 : vector<1x128xf32>
    %c0_14 = arith.constant 0 : index
    %c0_15 = arith.constant 0 : index
    %26 = vector.load %arg7[%c0_14, %c0_15] : memref<1x128xf32, #tpu.memory_space<vmem>>, vector<1x128xf32>
    tpu.vector_store %arg7[%c0_14, %c0_15], %25 {strides = array<i32>} : memref<1x128xf32, #tpu.memory_space<vmem>>, vector<1x128xf32>,
    %c0_i32_16 = arith.constant 0 : i32
    %27 = arith.cmpi eq, %arg2, %c0_i32_16 : i32
    %28 = arith.extui %27 : i1 to i32
    %c0_i32_17 = arith.constant 0 : i32
    %29 = arith.cmpi ne, %28, %c0_i32_17 : i32
    scf.if %29 {
      %c0_18 = arith.constant 0 : index
      %c0_19 = arith.constant 0 : index
      %30 = vector.load %arg6[%c0_18, %c0_19] : memref<4x128xf32, #tpu.memory_space<vmem>>, vector<4x128xf32>
      %cst_20 = arith.constant dense<0.000000e+00> : vector<4xf32>
      %31 = vector.multi_reduction <add>, %30, %cst_20 [1] : vector<4x128xf32> to vector<4xf32>
      %32 = vector.shape_cast %31 : vector<4xf32> to vector<4x1xf32>
      %c0_21 = arith.constant 0 : index
      %c0_22 = arith.constant 0 : index
      %c0_23 = arith.constant 0 : index
      %c0_24 = arith.constant 0 : index
      %33 = vector.load %arg4[%c0_21, %c0_22, %c0_23, %c0_24] : memref<1x1x4x1xf32, #tpu.memory_space<vmem>>, vector<1x1x4x1xf32>
      %34 = vector.shape_cast %33 : vector<1x1x4x1xf32> to vector<4x1xf32>
      %35 = vector.shape_cast %32 : vector<4x1xf32> to vector<1x1x4x1xf32>
      tpu.vector_store %arg4[%c0_21, %c0_22, %c0_23, %c0_24], %35 {strides = array<i32>} : memref<1x1x4x1xf32, #tpu.memory_space<vmem>>, vector<1x1x4x1xf32>,
      %c0_25 = arith.constant 0 : index
      %c0_26 = arith.constant 0 : index
      %36 = vector.load %arg7[%c0_25, %c0_26] : memref<1x128xf32, #tpu.memory_space<vmem>>, vector<1x128xf32>
      %cst_27 = arith.constant dense<0.000000e+00> : vector<1xf32>
      %37 = vector.multi_reduction <add>, %36, %cst_27 [1] : vector<1x128xf32> to vector<1xf32>
      %38 = vector.shape_cast %37 : vector<1xf32> to vector<1x1xf32>
      %c0_28 = arith.constant 0 : index
      %c0_29 = arith.constant 0 : index
      %c0_30 = arith.constant 0 : index
      %c0_31 = arith.constant 0 : index
      %39 = vector.load %arg5[%c0_28, %c0_29, %c0_30, %c0_31] : memref<1x1x1x1xf32, #tpu.memory_space<vmem>>, vector<1x1x1x1xf32>
      %40 = vector.shape_cast %39 : vector<1x1x1x1xf32> to vector<1x1xf32>
      %41 = vector.shape_cast %38 : vector<1x1xf32> to vector<1x1x1x1xf32>
      tpu.vector_store %arg5[%c0_28, %c0_29, %c0_30, %c0_31], %41 {strides = array<i32>} : memref<1x1x1x1xf32, #tpu.memory_space<vmem>>, vector<1x1x1x1xf32>,
    } else {
    }
    return
  }
  func.func @transform_0(%arg0: i32, %arg1: i32, %arg2: i32) -> (i32, i32, i32) {
    %c1_i32 = arith.constant 1 : i32
    %0 = arith.muli %arg1, %c1_i32 : i32
    %1 = arith.addi %0, %arg2 : i32
    %c0_i32 = arith.constant 0 : i32
    %c0_i32_0 = arith.constant 0 : i32
    return %arg0, %c0_i32, %1 : i32, i32, i32
  }
  func.func @transform_1(%arg0: i32, %arg1: i32, %arg2: i32) -> (i32, i32, i32, i32) {
    %c0_i32 = arith.constant 0 : i32
    %c0_i32_0 = arith.constant 0 : i32
    %c0_i32_1 = arith.constant 0 : i32
    return %arg0, %arg1, %c0_i32, %c0_i32_0 : i32, i32, i32, i32
  }
  func.func @transform_2(%arg0: i32, %arg1: i32, %arg2: i32) -> (i32, i32, i32, i32) {
    %c0_i32 = arith.constant 0 : i32
    %c0_i32_0 = arith.constant 0 : i32
    %c0_i32_1 = arith.constant 0 : i32
    return %arg0, %arg1, %c0_i32, %c0_i32_0 : i32, i32, i32, i32
  }
}

</mosaic_0001>

<bundles_post_ra>
// kernel: tpu_custom_call.1
= control target key start
LH: loop header
LB: loop body
LE: loop exit
PB: predicated region body
PF: predicated region fallthrough
CT: control target
= control target key end

     0   :  { %8 = vsyncpa [#allocation5], 0  ;;  %s759_s0 = inlined_call_operand.hbm [shape: f32[2,4,256], index: 0, kind: input, shape index: {}]   ;;  %s760_s1 = inlined_call_operand.vmem [shape: f32[2,2,4,1], index: 1, kind: output, shape index: {0}]   ;;  %s761_s2 = inlined_call_operand.vmem [shape: f32[2,2,1,1], index: 2, kind: output, shape index: {1}]  }
   0x1   :  { %10 = vsyncpa [#allocation5 + $0x1], 0  ;;  %s602_s9 = smov 0   ;;  %s604_s10 = smov 0  }
   0x2   :  { %s606_s11 = smov 0   ;;  %s608_s12 = smov 0  }
   0x3   :  { %s610_s13 = smov 0   ;;  %s612_s14 = smov 0  }
   0x4   :  { %s614_s15 = smov 0   ;;  %s616_s16 = smov 0  }
   0x5 LB: > { %s398_s17 = sadd.s32 4294967295, %s583_s16   ;;  %s31_s18 = sadd.s32 1, %s575_s14  ;;  %s583_s16 = sphi %s616_s16, %s16_s16   ;;  %s579_s15 = sphi %s614_s15, %s773_s15   ;;  %s575_s14 = sphi %s612_s14, %s772_s14   ;;  %s571_s13 = sphi %s610_s13, %s771_s13   ;;  %s567_s12 = sphi %s608_s12, %s770_s12   ;;  %s563_s11 = sphi %s606_s11, %s769_s11   ;;  %s559_s10 = sphi %s604_s10, %s768_s10   ;;  %s555_s9 = sphi %s602_s9, %s767_s9  }
   0x6   : > { %p33_p0 = scmp.ge.s32.totalorder %s31_s18, 2  ;;  %s35_s19 = sadd.s32 1, %s579_s15 }
   0x7   : > { %s46_s20 = sadd.s32 1, %s563_s11  ;;  %p53_p1 = scmp.ne.s32.totalorder %s563_s11, %s559_s10 }
   0x8   : > { %s775_s18 = smov (%p33_p0, %s31_s18), 0  ;;  %s777_s19 = smov (!%p33_p0, %s35_s19), %s579_s15 }
   0x9   : > { %s42_s21 = ssub.s32 %s575_s14, %s775_s18  ;;  %p54_p2 = scmp.eq.s32.totalorder %s583_s16, 0 }
   0xa   : > { %p37_p3 = scmp.ge.s32.totalorder %s777_s19, 2  ;;  %p59_p4 = scmp.ne.s32.totalorder %s559_s10, %s555_s9 }
   0xb   : > { %p653_p5 = por %p54_p2, %p53_p1  ;;  %p60_p6 = scmp.eq.s32.totalorder %s398_s17, 0 }
   0xc   : > { %s779_s19 = smov (%p37_p3, %s777_s19), 0  ;;  %p419_p8 = scmp.lt.s32.totalorder %s583_s16, 4 }
   0xd   : > { %p659_p7 = por %p60_p6, %p59_p4  ;;  %s41_s24 = ssub.s32 %s579_s15, %s779_s19 }
   0xe   : > { %s43_s25 = sor.u32 %s42_s21, %s41_s24  ;;  %s139_s26 = sand.u32 1, %s563_s11  }
   0xf   : > { %p44_p9 = scmp.eq.s32.totalorder %s43_s25, 0  ;;  %s402_s27 = sshll.u32 %s139_s26, 2 }
  0x10   : > { %s403_s28 = sshll.u32 %s579_s15, 1  ;;  %s143_s4 = scalar_lea.vmem [#allocation4], %s402_s27 }
  0x11   : > { %s669_s29 = scalar_select %p44_p9, %s563_s11, %s46_s20  }
  0x12   : > { %s149_s30 = sadd.s32 %s575_s14, %s403_s28  ;;  %s153_s5 = sshll.u32 %s143_s4, 4  ;;  %s677_s5 = int_to_ptr.vmem [resolvable:$true] %s153_s5 }
  0x13   : > { %s404_s3 = sshll.u32 %s149_s30, 6  ;;  %p683_p10 = pnand %p419_p8, %p653_p5 }
  0x14   : > { %s675_s8 = scalar_lea.hbm %s759_s0, %s404_s3  ;;  %s140_s17 = scalar_lea.sflag [#allocation5], %s139_s26 }
  0x15   : > { %s487_s20 = scalar_lea.hbm %s675_s8, 64  ;;  %p489_p0 = pneg %p683_p10 }
  0x16   : > { %p488_p13 = scmp.ne.s32.totalorder %s675_s8, %s487_s20  ;;  %s492_s24 = scalar_lea.hbm %s759_s0, 256 }
  0x17   : > { %p493_p3 = scmp.lt.u32.totalorder %s675_s8, %s759_s0  ;;  %p494_p4 = scmp.lt.u32.totalorder %s492_s24, %s487_s20 }
  0x18   : > { %p490_p1 = pnand %p489_p0, %p488_p13  ;;  %p496_p6 = scmp.lt.u32.totalorder %s487_s20, %s675_s8 }
  0x19   : > { %p495_p5 = por %p494_p4, %p493_p3 }
  0x1a   : > { %p491_p2 = pneg %p490_p1 }
  0x1b   : > { %p497_p8 = por %p496_p6, %p495_p5 }
  0x1d   : > { %p498_p9 = pnand %p497_p8, %p491_p2 }
  0x1f   : > { %501 = shalt.err (!%p498_p9)
}
  0x20   : > { %s502_s26 = scalar_lea.vmem %s677_s5, 64  ;;  %s585_s28 = smov [#allocation4]  }
  0x21   : > { %p503_p13 = scmp.ne.s32.totalorder %s677_s5, %s502_s26  ;;  %s507_s30 = sshll.u32 %s585_s28, 4  ;;  %s508_s30 = int_to_ptr.vmem [resolvable:$false] %s507_s30 }
  0x22   : > { %s509_s3 = scalar_lea.vmem %s508_s30, 128  ;;  %p510_p12 = scmp.lt.s32.totalorder %s677_s5, %s508_s30 }
  0x23   : > { %p505_p1 = pnand %p503_p13, %p489_p0  ;;  %p511_p3 = scmp.lt.s32.totalorder %s509_s3, %s502_s26 }
  0x25   : > { %p506_p11 = pneg %p505_p1  ;;  %p512_p4 = por %p511_p3, %p510_p12 }
  0x27   : > { %p513_p5 = pnand %p512_p4, %p506_p11 }
  0x29   : > { %516 = shalt.err (!%p513_p5)
}
  0x2a   : > { %418 = dma.hbm_to_vmem [thread:$0]  (!%p683_p10), %s675_s8, 64, %s677_s5, %s140_s17  }
  0x2b   : > { %p765_p2 = scmp.lt.s32.totalorder %s583_s16, 5  ;;  %p766_p6 = scmp.ge.s32.totalorder %s583_s16, 1 }
  0x2d   : > { %p159_p0 = pnand %p766_p6, %p765_p2 }
  0x2e   : > { %s164_s4 = sand.u32 (!%p159_p0), 1, %s559_s10  }
  0x2f   : > { %162 = sbr.rel (%p159_p0) target bundleno = 248 (0xf8), region = 24  ;;  %s406_s6 = sshll.u32 (!%p159_p0), %s164_s4, 2 }
  0x30   : > { %s165_s7 = scalar_lea.sflag (!%p159_p0), [#allocation5], %s164_s4  ;;  %s168_s20 = scalar_lea.vmem (!%p159_p0), [#allocation4], %s406_s6 }
  0x36   : > { %550 = dma.done.wait (%p659_p7), %s165_s7, 64  }
  0x37   : > { %552 = vsyncadd (%p659_p7), %s165_s7, 4294967232  ;;  %v586_v0 = vmov 0.0   ;;  %v221_v1 = vld [vmem:[%s168_s20] sm:$0xf]  ;;  %vm223_vm0 = vcmask 1043456   ;;  %vm253_vm1 = vcmask 1040384  }
  0x38   : > { %219 = vst [vmem:[#allocation2] sm:$0xf] %v586_v0  ;;  %220 = vst [vmem:[#allocation3] sm:$0x1] %v586_v0  ;;  %v222_v2 = vmul.f32 %v221_v1, %v221_v1  ;;  %p200_p7 = scmp.lt.s32.totalorder %s571_s13, 1  ;;  %p202_p10 = scmp.lt.s32.totalorder %s567_s12, 1 }
  0x39   : > { %vm250_vm2 = vcmask 3072   ;;  %vm257_vm3 = vcmask 0  }
  0x3a   : > { %v224_v3 = vsel %vm223_vm0, %v222_v2, 0.0  ;;  %s781_s13 = smov (!%p200_p7, %s571_s13), 1  ;;  %s783_s12 = smov (!%p202_p10, %s567_s12), 1 }
  0x3b   : > { %v225_v4 = vrot.slane %v224_v3, 4  ;;  %s407_s23 = sshll.u32 %s781_s13, 1 }
  0x3c   : > { %s205_s5 = sadd.s32 %s407_s23, %s783_s12 }
  0x3d   : > { %v226_v5 = vadd.f32 %v225_v4, %v224_v3  ;;  %s408_s8 = sshll.u32 %s205_s5, 2  ;;  %s214_s25 = scalar_lea.vmem %s761_s2, %s205_s5 }
  0x3e   : > { %s207_s21 = scalar_lea.vmem %s760_s1, %s408_s8 }
  0x3f   : > { %v227_v6 = vrot.slane %v226_v5, 2  ;;  %v236_v14 = vld [vmem:[#allocation2] sm:$0xf]  ;;  %v240_v15 = vld [vmem:[#allocation3] sm:$0x1] }
  0x41   : > { %v228_v7 = vadd.f32 %v227_v6, %v226_v5 }
  0x43   : > { %v229_v8 = vrot.slane %v228_v7, 1 }
  0x45   : > { %v230_v9 = vadd.f32 %v229_v8, %v228_v7 }
  0x47   : > { %v231_v10 = vsub.f32 1.0, %v230_v9 }
  0x49   : > { %v232_v11 = vmax.f32 %v231_v10, 1e-07 }
  0x4b   : > { %485 = vrcp.f32 %v232_v11 }
  0x55   : > { %v486_v12 = vpop.eup %485 }
  0x56   : > { %v234_v13 = vmul.f32 2.0, %v486_v12 }
  0x58   : > { %v410_v16 = vadd.f32 -1.0, %v234_v13  ;;  %v237_v17 = vmul.f32 %v234_v13, %v221_v1 }
  0x5a   : > { %v238_v18 = vadd.f32 %v237_v17, %v236_v14  ;;  %v241_v19 = vadd.f32 %v410_v16, %v240_v15 }
  0x5c   : > { %239 = vst [vmem:[#allocation2] sm:$0xf] %v238_v18  ;;  %242 = vst [vmem:[#allocation3] sm:$0x1] %v241_v19 }
  0x63   : > { %v246_v20 = vld [vmem:[#allocation2] sm:$0xf]  ;;  %v252_v21 = vld [vmem:[#allocation3] sm:$0x1] }
  0x64   : > { %v247_v22 = vsel %vm223_vm0, %v246_v20, 0.0  ;;  %v254_v23 = vsel %vm253_vm1, %v252_v21, 0.0 }
  0x65   : > { %248 = vadd.xlane.f32.xlu0 %v247_v22 }
  0x69   : > { %255 = vadd.xlane.f32.xlu0 %v254_v23 }
  0xf2   : > { %v249_v24 = vpop.xlane.xlu0 %248 }
  0xf3   : > { %251 = vst.msk [vmem:[%s207_s21] sm:$0xf] %vm250_vm2, %v249_v24 }
  0xf6   : > { %v256_v25 = vpop.xlane.xlu0 %255 }
  0xf7   : > { %258 = vst.msk [vmem:[%s214_s25] sm:$0x1] %vm257_vm3, %v256_v25 }
  0xf8 PF: > { %s16_s16 = sadd.s32 1, %s583_s16   ;;  %s767_s9 = smov %s559_s10 }
  0xf9   : > { %p13_p11 = scmp.ge.s32.totalorder %s16_s16, 6   ;;  %s768_s10 = smov %s563_s11 }
  0xfa   : > { %s769_s11 = smov %s669_s29  ;;  %s770_s12 = smov %s575_s14 }
  0xfb   : > { %s771_s13 = smov %s579_s15  ;;  %s772_s14 = smov %s775_s18 }
  0xfc   : > { %s773_s15 = smov %s779_s19  ;;  %15 = sbr.rel (!%p13_p11) target bundleno = 5 (0x5), region = 84 }
 0x103   :  { %306 = vsyncpa [#allocation5], 1 }
 0x104   :  { %308 = vsyncpa [#allocation5 + $0x1], 1 }

</bundles_post_ra>
